<compile_context>
chip_gen: v7x
topology: tpu7x:2x2x1
jax: 0.10.0
libtpu: 0.0.40
codegen_flags: <defaults>
</compile_context>

<pallas_src>
import functools
import math

import jax
import jax.numpy as jnp
import numpy as np
from jax.experimental import pallas as pl
from jax.experimental.pallas import tpu as pltpu

ALPHA_SAL = 0.7
W0, W1 = 1.0, 1.12           # weighted_bce weights used in forward()
EPS = 1e-15                  # eps of weighted_bce
LOG_CLAMP = -100.0           # torch F.binary_cross_entropy clamps log at -100


# ----------------------------------------------------------------------------
# Kernel helpers
# ----------------------------------------------------------------------------
def _laplacian_conv(x, masks):
    """conv2d(x, [[-1,-1,-1],[-1,8,-1],[-1,-1,-1]], padding=1) on stacked images.

    `x` is (R, We): rows of (possibly lane-packed) images.  conv = 9*x - box3x3,
    using 4 XLU rolls; the precomputed boundary masks supply the zero padding and
    also zero any wrap across image boundaries inside the stacked block.
    """
    not_left, not_right, not_top, not_bot = masks
    R, We = x.shape
    left = jnp.where(not_left, pltpu.roll(x, shift=1, axis=1), 0.0)
    right = jnp.where(not_right, pltpu.roll(x, shift=We - 1, axis=1), 0.0)
    hsum = x + left + right
    up = jnp.where(not_top, pltpu.roll(hsum, shift=1, axis=0), 0.0)
    down = jnp.where(not_bot, pltpu.roll(hsum, shift=R - 1, axis=0), 0.0)
    return 9.0 * x - (hsum + up + down)


def _tile_partial_sum(x):
    """Reduce an (R, We) f32 tile to an (8, We) per-vreg-slot partial sum."""
    R, We = x.shape
    if R % 8 == 0:
        return x.reshape(R // 8, 8, We).sum(axis=0)
    # Rare fallback (only reachable when grid == 1 and rows % 8 != 0).
    s = jnp.sum(x)
    rr = jax.lax.broadcasted_iota(jnp.int32, (8, We), 0)
    cc = jax.lax.broadcasted_iota(jnp.int32, (8, We), 1)
    return jnp.where((rr == 0) & (cc == 0), s, 0.0)


def _edge_saliency_kernel(yp_ref, yg_ref, sal_ref, edge_ref, *,
                          img_h, img_w, gt_is_binary):
    yp = yp_ref[...].astype(jnp.float32)   # (R, We)
    yg = yg_ref[...].astype(jnp.float32)
    R, We = yp.shape

    # Boundary masks, built once on reduced shapes; broadcast inside jnp.where.
    col = jax.lax.broadcasted_iota(jnp.int32, (1, We), 1) % img_w
    row = jax.lax.broadcasted_iota(jnp.int32, (R, 1), 0) % img_h
    masks = (col != 0, col != img_w - 1, row != 0, row != img_h - 1)

    # ---- saliency term: weighted BCE on the raw maps ----
    if gt_is_binary:
        pos = yg > 0.5
        logv = jnp.log(jnp.where(pos, yp + EPS, 1.0 - yp + EPS))
        wbce = jnp.where(pos, W1, W0) * (-logv)
    else:
        wbce = (-W1 * yg * jnp.log(yp + EPS)
                - W0 * (1.0 - yg) * jnp.log(1.0 - yp + EPS))
    sal_ref[...] = _tile_partial_sum(wbce)

    # ---- edge term: BCE between Laplacian edge maps ----
    conv_p = _laplacian_conv(yp, masks)
    pe = jnp.maximum(jnp.tanh(conv_p), 0.0)

    conv_g = _laplacian_conv(yg, masks)
    if gt_is_binary:
        # conv_g is an exact integer in [-8, 8]; relu(tanh(.)) via a VPU select
        # ladder instead of an EUP tanh.
        ge = jnp.zeros_like(conv_g)
        for n in range(1, 9):
            ge = jnp.where(conv_g >= (n - 0.5), float(math.tanh(n)), ge)
    else:
        ge = jnp.maximum(jnp.tanh(conv_g), 0.0)

    log_pe = jnp.maximum(jnp.log(pe), LOG_CLAMP)
    log_1mpe = jnp.maximum(jnp.log(1.0 - pe), LOG_CLAMP)
    bce = -(ge * log_pe + (1.0 - ge) * log_1mpe)
    edge_ref[...] = _tile_partial_sum(bce)


# ----------------------------------------------------------------------------
# Wrapper-side tiling decisions
# ----------------------------------------------------------------------------
def _vmem_capacity_bytes():
    try:
        return int(pltpu.get_tpu_info().vmem_capacity_bytes)
    except Exception:
        return 64 << 20      # conservative fallback (v7x-sized)


def _pick_lane_pack(batch, img_w):
    """Largest divisor k of batch with k*img_w <= 128 (lane-fill packing)."""
    kmax = max(1, 128 // img_w)
    for k in range(min(kmax, batch), 0, -1):
        if batch % k == 0:
            return k
    return 1


def _pick_images_per_block(batch, img_h, lane_w, itemsize, target_bytes, sublane):
    """Largest divisor of `batch` whose block fits the byte budget, keeps the
    sublane extent a multiple of `sublane`, and leaves grid >= 2 when batch >= 2.
    Falls back to one full-extent block (always a legal BlockSpec)."""
    per_img = img_h * lane_w * itemsize
    cap = max(1, target_bytes // per_img)
    if batch >= 2:
        cap = min(cap, batch // 2)            # megacore / pipeline overlap
    for d in range(min(batch, cap), 0, -1):
        if batch % d == 0 and (d * img_h) % sublane == 0:
            return d
    return batch


def edge_saliency_loss(y_pred, y_gt, alpha_sal=ALPHA_SAL, *,
                       gt_is_binary=False, block_target_bytes=None):
    """y_pred, y_gt: (B, 1, H, W) arrays with values in [0, 1].

    gt_is_binary=True enables a faster path that is exact only when y_gt is a
    0/1 mask (single-log weighted BCE + select-ladder tanh on the gt edges).
    """
    B, C, H, W = y_pred.shape
    assert C == 1, "laplacian kernel is single-channel (1,1,3,3)"

    # Keep bf16/f16 inputs as-is over HBM (kernel upcasts to f32 internally).
    in_dtype = y_pred.dtype if y_pred.dtype in (jnp.float32, jnp.bfloat16,
                                                jnp.float16) else jnp.float32
    itemsize = np.dtype(in_dtype).itemsize

    vmem_cap = _vmem_capacity_bytes()
    vmem_limit = (64 << 20) if vmem_cap >= (128 << 20) else (32 << 20)
    if block_target_bytes is None:
        block_target_bytes = (1 << 20) if vmem_cap <= (64 << 20) else (2 << 20)

    # Lane packing: k images side by side along the lane axis.
    k = _pick_lane_pack(B, W)
    b_eff, w_eff = B // k, k * W

    def flatten(x):
        x = x.reshape(b_eff, k, H, W).transpose(0, 2, 1, 3)
        return x.reshape(b_eff * H, w_eff).astype(in_dtype)

    yp, yg = flatten(y_pred), flatten(y_gt)

    sublane = 16 if itemsize == 2 else 8
    bt = _pick_images_per_block(b_eff, H, w_eff, itemsize,
                                block_target_bytes, sublane)
    grid = b_eff // bt
    rows = bt * H

    elems = B * H * W
    trans_per_elem = 4 if gt_is_binary else 6
    cost = pl.CostEstimate(
        flops=70 * elems,
        transcendentals=trans_per_elem * elems,
        bytes_accessed=2 * elems * itemsize + 2 * grid * 8 * w_eff * 4,
    )

    sal_part, edge_part = pl.pallas_call(
        functools.partial(_edge_saliency_kernel, img_h=H, img_w=W,
                          gt_is_binary=gt_is_binary),
        out_shape=(jax.ShapeDtypeStruct((grid * 8, w_eff), jnp.float32),
                   jax.ShapeDtypeStruct((grid * 8, w_eff), jnp.float32)),
        grid_spec=pltpu.PrefetchScalarGridSpec(
            num_scalar_prefetch=0,
            grid=(grid,),
            in_specs=[pl.BlockSpec((rows, w_eff), lambda g: (g, 0)),
                      pl.BlockSpec((rows, w_eff), lambda g: (g, 0))],
            out_specs=[pl.BlockSpec((8, w_eff), lambda g: (g, 0)),
                       pl.BlockSpec((8, w_eff), lambda g: (g, 0))]),
        compiler_params=pltpu.CompilerParams(
            dimension_semantics=("parallel",),
            vmem_limit_bytes=vmem_limit),
        cost_estimate=cost,
    )(yp, yg)

    n = B * H * W                             # numel of (B, 1, H, W)
    sal_loss = jnp.sum(sal_part) / n
    edge_loss = jnp.sum(edge_part) / n
    return alpha_sal * sal_loss + (1.0 - alpha_sal) * edge_loss


# ----------------------------------------------------------------------------
# Pure-JAX reference mirroring the PyTorch module semantics
# ----------------------------------------------------------------------------
def _reference_loss(y_pred, y_gt, alpha_sal=ALPHA_SAL):
    def edges(x):  # x: (B, 1, H, W)
        B, _, H, W = x.shape
        xp = jnp.pad(x[:, 0], ((0, 0), (1, 1), (1, 1)))
        conv = (8.0 * xp[:, 1:H + 1, 1:W + 1]
                - xp[:, 0:H, 0:W] - xp[:, 0:H, 1:W + 1] - xp[:, 0:H, 2:W + 2]
                - xp[:, 1:H + 1, 0:W] - xp[:, 1:H + 1, 2:W + 2]
                - xp[:, 2:H + 2, 0:W] - xp[:, 2:H + 2, 1:W + 1] - xp[:, 2:H + 2, 2:W + 2])
        return jnp.maximum(jnp.tanh(conv), 0.0)

    y_pred = y_pred.astype(jnp.float32)
    y_gt = y_gt.astype(jnp.float32)
    wbce = (-W1 * y_gt * jnp.log(y_pred + EPS)
            - W0 * (1.0 - y_gt) * jnp.log(1.0 - y_pred + EPS))
    sal_loss = jnp.mean(wbce)
    pe, ge = edges(y_pred), edges(y_gt)
    bce = -(ge * jnp.maximum(jnp.log(pe), LOG_CLAMP)
            + (1.0 - ge) * jnp.maximum(jnp.log(1.0 - pe), LOG_CLAMP))
    edge_loss = jnp.mean(bce)
    return alpha_sal * sal_loss + (1.0 - alpha_sal) * edge_loss


if __name__ == "__main__":
    key = jax.random.PRNGKey(0)
    kp, kg = jax.random.split(key)
    B, C, H, W = 2, 1, 16, 16
    # predictions in (0, 1) like sigmoid outputs; ground truth binary mask
    y_pred = jax.nn.sigmoid(jax.random.normal(kp, (B, C, H, W), jnp.float32))
    y_gt = jax.random.bernoulli(kg, 0.3, (B, C, H, W)).astype(jnp.float32)

    ref = jax.block_until_ready(_reference_loss(y_pred, y_gt))

    # General path (exact module semantics for arbitrary y_gt in [0,1]).
    loss = jax.block_until_ready(edge_saliency_loss(y_pred, y_gt))
    assert jnp.isfinite(loss), "kernel produced non-finite loss"
    assert abs(float(loss) - float(ref)) < 1e-4 * (1.0 + abs(float(ref))), \
        f"mismatch: kernel={float(loss)} ref={float(ref)}"

    # Binary-gt fast path (fewer EUP transcendentals); identical for 0/1 masks.
    loss_bin = jax.block_until_ready(
        edge_saliency_loss(y_pred, y_gt, gt_is_binary=True))
    assert abs(float(loss_bin) - float(ref)) < 1e-4 * (1.0 + abs(float(ref))), \
        f"binary-path mismatch: kernel={float(loss_bin)} ref={float(ref)}"

    # Multi-block "parallel" grid + full 128-lane packing (8 images per vreg row).
    kp2, kg2 = jax.random.split(jax.random.PRNGKey(1))
    yp2 = jax.nn.sigmoid(jax.random.normal(kp2, (16, 1, H, W), jnp.float32))
    yg2 = jax.random.bernoulli(kg2, 0.3, (16, 1, H, W)).astype(jnp.float32)
    loss2 = jax.block_until_ready(
        edge_saliency_loss(yp2, yg2, block_target_bytes=1024))
    ref2 = jax.block_until_ready(_reference_loss(yp2, yg2))
    assert abs(float(loss2) - float(ref2)) < 1e-4 * (1.0 + abs(float(ref2))), \
        f"multi-block mismatch: kernel={float(loss2)} ref={float(ref2)}"

    # bf16 pass-through over HBM (compute stays f32 inside the kernel).
    loss_bf16 = jax.block_until_ready(
        edge_saliency_loss(y_pred.astype(jnp.bfloat16),
                           y_gt.astype(jnp.bfloat16)))
    ref_bf16 = jax.block_until_ready(
        _reference_loss(y_pred.astype(jnp.bfloat16),
                        y_gt.astype(jnp.bfloat16)))
    assert abs(float(loss_bf16) - float(ref_bf16)) < 1e-3 * (1.0 + abs(float(ref_bf16))), \
        f"bf16 mismatch: kernel={float(loss_bf16)} ref={float(ref_bf16)}"

    print("KERNEL_OK")
</pallas_src>

<mosaic_0001>
module attributes {stable_mosaic.version = 11 : i64} {
  func.func @_edge_saliency_kernel(%arg0: i32, %arg1: memref<16x32xf32, #tpu.memory_space<vmem>>, %arg2: memref<16x32xf32, #tpu.memory_space<vmem>>, %arg3: memref<8x32xf32, #tpu.memory_space<vmem>>, %arg4: memref<8x32xf32, #tpu.memory_space<vmem>>) attributes {dimension_semantics = [#tpu.dimension_semantics<parallel>], iteration_bounds = array<i64: 1>, scalar_prefetch = 0 : i64, scratch_operands = 0 : i64, tpu.core_type = #tpu.core_type<tc>, window_params = [{transform_indices = @transform_0, window_bounds = array<i64: 16, 32>}, {transform_indices = @transform_1, window_bounds = array<i64: 16, 32>}, {transform_indices = @transform_2, window_bounds = array<i64: 8, 32>}, {transform_indices = @transform_3, window_bounds = array<i64: 8, 32>}]} {
    %c0 = arith.constant 0 : index
    %c0_0 = arith.constant 0 : index
    %0 = vector.load %arg1[%c0, %c0_0] : memref<16x32xf32, #tpu.memory_space<vmem>>, vector<16x32xf32>
    %c0_1 = arith.constant 0 : index
    %c0_2 = arith.constant 0 : index
    %1 = vector.load %arg2[%c0_1, %c0_2] : memref<16x32xf32, #tpu.memory_space<vmem>>, vector<16x32xf32>
    %2 = tpu.iota {dimensions = array<i32: 1>} : vector<1x32xi32>
    %c16_i32 = arith.constant 16 : i32
    %c0_i32 = arith.constant 0 : i32
    %3 = arith.cmpi eq, %c16_i32, %c0_i32 : i32
    %c1_i32 = arith.constant 1 : i32
    %4 = arith.select %3, %c1_i32, %c16_i32 : i32
    %5 = vector.broadcast %4 : i32 to vector<1x32xi32>
    %6 = arith.remsi %2, %5 : vector<1x32xi32>
    %c0_i32_3 = arith.constant 0 : i32
    %7 = vector.broadcast %c0_i32_3 : i32 to vector<1x32xi32>
    %8 = arith.cmpi ne, %6, %7 : vector<1x32xi32>
    %c0_i32_4 = arith.constant 0 : i32
    %9 = vector.broadcast %c0_i32_4 : i32 to vector<1x32xi32>
    %10 = arith.cmpi slt, %6, %9 : vector<1x32xi32>
    %c0_i32_5 = arith.constant 0 : i32
    %11 = arith.cmpi slt, %4, %c0_i32_5 : i32
    %12 = vector.broadcast %11 : i1 to vector<1x32xi1>
    %13 = vector.broadcast %12 : vector<1x32xi1> to vector<1x32xi1>
    %14 = arith.xori %10, %13 : vector<1x32xi1>
    %15 = arith.andi %14, %8 : vector<1x32xi1>
    %16 = vector.broadcast %4 : i32 to vector<1x32xi32>
    %17 = arith.addi %6, %16 : vector<1x32xi32>
    %18 = arith.select %15, %17, %6 : vector<1x32xi1>, vector<1x32xi32>
    %19 = tpu.iota {dimensions = array<i32: 0>} : vector<16x1xi32>
    %c16_i32_6 = arith.constant 16 : i32
    %c0_i32_7 = arith.constant 0 : i32
    %20 = arith.cmpi eq, %c16_i32_6, %c0_i32_7 : i32
    %c1_i32_8 = arith.constant 1 : i32
    %21 = arith.select %20, %c1_i32_8, %c16_i32_6 : i32
    %22 = vector.broadcast %21 : i32 to vector<16x1xi32>
    %23 = arith.remsi %19, %22 : vector<16x1xi32>
    %c0_i32_9 = arith.constant 0 : i32
    %24 = vector.broadcast %c0_i32_9 : i32 to vector<16x1xi32>
    %25 = arith.cmpi ne, %23, %24 : vector<16x1xi32>
    %c0_i32_10 = arith.constant 0 : i32
    %26 = vector.broadcast %c0_i32_10 : i32 to vector<16x1xi32>
    %27 = arith.cmpi slt, %23, %26 : vector<16x1xi32>
    %c0_i32_11 = arith.constant 0 : i32
    %28 = arith.cmpi slt, %21, %c0_i32_11 : i32
    %29 = vector.broadcast %28 : i1 to vector<16x1xi1>
    %30 = vector.broadcast %29 : vector<16x1xi1> to vector<16x1xi1>
    %31 = arith.xori %27, %30 : vector<16x1xi1>
    %32 = arith.andi %31, %25 : vector<16x1xi1>
    %33 = vector.broadcast %21 : i32 to vector<16x1xi32>
    %34 = arith.addi %23, %33 : vector<16x1xi32>
    %35 = arith.select %32, %34, %23 : vector<16x1xi1>, vector<16x1xi32>
    %c0_i32_12 = arith.constant 0 : i32
    %36 = vector.broadcast %c0_i32_12 : i32 to vector<1x32xi32>
    %37 = arith.cmpi ne, %18, %36 : vector<1x32xi32>
    %c15_i32 = arith.constant 15 : i32
    %38 = vector.broadcast %c15_i32 : i32 to vector<1x32xi32>
    %39 = arith.cmpi ne, %18, %38 : vector<1x32xi32>
    %c0_i32_13 = arith.constant 0 : i32
    %40 = vector.broadcast %c0_i32_13 : i32 to vector<16x1xi32>
    %41 = arith.cmpi ne, %35, %40 : vector<16x1xi32>
    %c15_i32_14 = arith.constant 15 : i32
    %42 = vector.broadcast %c15_i32_14 : i32 to vector<16x1xi32>
    %43 = arith.cmpi ne, %35, %42 : vector<16x1xi32>
    %cst = arith.constant -1.120000e+00 : f32
    %44 = vector.broadcast %cst : f32 to vector<16x32xf32>
    %45 = arith.mulf %44, %1 : vector<16x32xf32>
    %cst_15 = arith.constant 1.000000e-15 : f32
    %46 = vector.broadcast %cst_15 : f32 to vector<16x32xf32>
    %47 = arith.addf %0, %46 : vector<16x32xf32>
    %48 = math.log %47 : vector<16x32xf32>
    %49 = arith.mulf %45, %48 : vector<16x32xf32>
    %cst_16 = arith.constant 1.000000e+00 : f32
    %50 = vector.broadcast %cst_16 : f32 to vector<16x32xf32>
    %51 = arith.subf %50, %1 : vector<16x32xf32>
    %cst_17 = arith.constant 1.000000e+00 : f32
    %52 = vector.broadcast %cst_17 : f32 to vector<16x32xf32>
    %53 = arith.mulf %52, %51 : vector<16x32xf32>
    %cst_18 = arith.constant 1.000000e+00 : f32
    %54 = vector.broadcast %cst_18 : f32 to vector<16x32xf32>
    %55 = arith.subf %54, %0 : vector<16x32xf32>
    %cst_19 = arith.constant 1.000000e-15 : f32
    %56 = vector.broadcast %cst_19 : f32 to vector<16x32xf32>
    %57 = arith.addf %55, %56 : vector<16x32xf32>
    %58 = math.log %57 : vector<16x32xf32>
    %59 = arith.mulf %53, %58 : vector<16x32xf32>
    %60 = arith.subf %49, %59 : vector<16x32xf32>
    %61 = vector.shape_cast %60 : vector<16x32xf32> to vector<2x8x32xf32>
    %cst_20 = arith.constant dense<0.000000e+00> : vector<8x32xf32>
    %62 = vector.multi_reduction <add>, %61, %cst_20 [0] : vector<2x8x32xf32> to vector<8x32xf32>
    %c0_21 = arith.constant 0 : index
    %c0_22 = arith.constant 0 : index
    %63 = vector.load %arg3[%c0_21, %c0_22] : memref<8x32xf32, #tpu.memory_space<vmem>>, vector<8x32xf32>
    tpu.vector_store %arg3[%c0_21, %c0_22], %62 {strides = array<i32>} : memref<8x32xf32, #tpu.memory_space<vmem>>, vector<8x32xf32>,
    %c1_i32_23 = arith.constant 1 : i32
    %64 = tpu.dynamic_rotate %0 by %c1_i32_23 dim 1 : vector<16x32xf32>, i32 -> vector<16x32xf32>
    %cst_24 = arith.constant 0.000000e+00 : f32
    %65 = vector.shape_cast %37 : vector<1x32xi1> to vector<1x32xi1>
    %66 = vector.broadcast %65 : vector<1x32xi1> to vector<16x32xi1>
    %67 = vector.broadcast %cst_24 : f32 to vector<16x32xf32>
    %68 = arith.select %66, %64, %67 : vector<16x32xi1>, vector<16x32xf32>
    %c31_i32 = arith.constant 31 : i32
    %69 = tpu.dynamic_rotate %0 by %c31_i32 dim 1 : vector<16x32xf32>, i32 -> vector<16x32xf32>
    %cst_25 = arith.constant 0.000000e+00 : f32
    %70 = vector.shape_cast %39 : vector<1x32xi1> to vector<1x32xi1>
    %71 = vector.broadcast %70 : vector<1x32xi1> to vector<16x32xi1>
    %72 = vector.broadcast %cst_25 : f32 to vector<16x32xf32>
    %73 = arith.select %71, %69, %72 : vector<16x32xi1>, vector<16x32xf32>
    %74 = arith.addf %0, %68 : vector<16x32xf32>
    %75 = arith.addf %74, %73 : vector<16x32xf32>
    %c1_i32_26 = arith.constant 1 : i32
    %76 = tpu.dynamic_rotate %75 by %c1_i32_26 dim 0 : vector<16x32xf32>, i32 -> vector<16x32xf32>
    %cst_27 = arith.constant 0.000000e+00 : f32
    %77 = vector.shape_cast %41 : vector<16x1xi1> to vector<16x1xi1>
    %78 = vector.broadcast %77 : vector<16x1xi1> to vector<16x32xi1>
    %79 = vector.broadcast %cst_27 : f32 to vector<16x32xf32>
    %80 = arith.select %78, %76, %79 : vector<16x32xi1>, vector<16x32xf32>
    %c15_i32_28 = arith.constant 15 : i32
    %81 = tpu.dynamic_rotate %75 by %c15_i32_28 dim 0 : vector<16x32xf32>, i32 -> vector<16x32xf32>
    %cst_29 = arith.constant 0.000000e+00 : f32
    %82 = vector.shape_cast %43 : vector<16x1xi1> to vector<16x1xi1>
    %83 = vector.broadcast %82 : vector<16x1xi1> to vector<16x32xi1>
    %84 = vector.broadcast %cst_29 : f32 to vector<16x32xf32>
    %85 = arith.select %83, %81, %84 : vector<16x32xi1>, vector<16x32xf32>
    %cst_30 = arith.constant 9.000000e+00 : f32
    %86 = vector.broadcast %cst_30 : f32 to vector<16x32xf32>
    %87 = arith.mulf %86, %0 : vector<16x32xf32>
    %88 = arith.addf %75, %80 : vector<16x32xf32>
    %89 = arith.addf %88, %85 : vector<16x32xf32>
    %90 = arith.subf %87, %89 : vector<16x32xf32>
    %91 = math.tanh %90 : vector<16x32xf32>
    %cst_31 = arith.constant 0.000000e+00 : f32
    %92 = vector.broadcast %cst_31 : f32 to vector<16x32xf32>
    %93 = arith.maximumf %91, %92 : vector<16x32xf32>
    %c1_i32_32 = arith.constant 1 : i32
    %94 = tpu.dynamic_rotate %1 by %c1_i32_32 dim 1 : vector<16x32xf32>, i32 -> vector<16x32xf32>
    %cst_33 = arith.constant 0.000000e+00 : f32
    %95 = vector.shape_cast %37 : vector<1x32xi1> to vector<1x32xi1>
    %96 = vector.broadcast %95 : vector<1x32xi1> to vector<16x32xi1>
    %97 = vector.broadcast %cst_33 : f32 to vector<16x32xf32>
    %98 = arith.select %96, %94, %97 : vector<16x32xi1>, vector<16x32xf32>
    %c31_i32_34 = arith.constant 31 : i32
    %99 = tpu.dynamic_rotate %1 by %c31_i32_34 dim 1 : vector<16x32xf32>, i32 -> vector<16x32xf32>
    %cst_35 = arith.constant 0.000000e+00 : f32
    %100 = vector.shape_cast %39 : vector<1x32xi1> to vector<1x32xi1>
    %101 = vector.broadcast %100 : vector<1x32xi1> to vector<16x32xi1>
    %102 = vector.broadcast %cst_35 : f32 to vector<16x32xf32>
    %103 = arith.select %101, %99, %102 : vector<16x32xi1>, vector<16x32xf32>
    %104 = arith.addf %1, %98 : vector<16x32xf32>
    %105 = arith.addf %104, %103 : vector<16x32xf32>
    %c1_i32_36 = arith.constant 1 : i32
    %106 = tpu.dynamic_rotate %105 by %c1_i32_36 dim 0 : vector<16x32xf32>, i32 -> vector<16x32xf32>
    %cst_37 = arith.constant 0.000000e+00 : f32
    %107 = vector.shape_cast %41 : vector<16x1xi1> to vector<16x1xi1>
    %108 = vector.broadcast %107 : vector<16x1xi1> to vector<16x32xi1>
    %109 = vector.broadcast %cst_37 : f32 to vector<16x32xf32>
    %110 = arith.select %108, %106, %109 : vector<16x32xi1>, vector<16x32xf32>
    %c15_i32_38 = arith.constant 15 : i32
    %111 = tpu.dynamic_rotate %105 by %c15_i32_38 dim 0 : vector<16x32xf32>, i32 -> vector<16x32xf32>
    %cst_39 = arith.constant 0.000000e+00 : f32
    %112 = vector.shape_cast %43 : vector<16x1xi1> to vector<16x1xi1>
    %113 = vector.broadcast %112 : vector<16x1xi1> to vector<16x32xi1>
    %114 = vector.broadcast %cst_39 : f32 to vector<16x32xf32>
    %115 = arith.select %113, %111, %114 : vector<16x32xi1>, vector<16x32xf32>
    %cst_40 = arith.constant 9.000000e+00 : f32
    %116 = vector.broadcast %cst_40 : f32 to vector<16x32xf32>
    %117 = arith.mulf %116, %1 : vector<16x32xf32>
    %118 = arith.addf %105, %110 : vector<16x32xf32>
    %119 = arith.addf %118, %115 : vector<16x32xf32>
    %120 = arith.subf %117, %119 : vector<16x32xf32>
    %121 = math.tanh %120 : vector<16x32xf32>
    %cst_41 = arith.constant 0.000000e+00 : f32
    %122 = vector.broadcast %cst_41 : f32 to vector<16x32xf32>
    %123 = arith.maximumf %121, %122 : vector<16x32xf32>
    %124 = math.log %93 : vector<16x32xf32>
    %cst_42 = arith.constant -1.000000e+02 : f32
    %125 = vector.broadcast %cst_42 : f32 to vector<16x32xf32>
    %126 = arith.maximumf %124, %125 : vector<16x32xf32>
    %cst_43 = arith.constant 1.000000e+00 : f32
    %127 = vector.broadcast %cst_43 : f32 to vector<16x32xf32>
    %128 = arith.subf %127, %93 : vector<16x32xf32>
    %129 = math.log %128 : vector<16x32xf32>
    %cst_44 = arith.constant -1.000000e+02 : f32
    %130 = vector.broadcast %cst_44 : f32 to vector<16x32xf32>
    %131 = arith.maximumf %129, %130 : vector<16x32xf32>
    %132 = arith.mulf %123, %126 : vector<16x32xf32>
    %cst_45 = arith.constant 1.000000e+00 : f32
    %133 = vector.broadcast %cst_45 : f32 to vector<16x32xf32>
    %134 = arith.subf %133, %123 : vector<16x32xf32>
    %135 = arith.mulf %134, %131 : vector<16x32xf32>
    %136 = arith.addf %132, %135 : vector<16x32xf32>
    %cst_46 = arith.constant 0.000000e+00 : f32
    %137 = vector.broadcast %cst_46 : f32 to vector<16x32xf32>
    %138 = arith.subf %137, %136 : vector<16x32xf32>
    %139 = vector.shape_cast %138 : vector<16x32xf32> to vector<2x8x32xf32>
    %cst_47 = arith.constant dense<0.000000e+00> : vector<8x32xf32>
    %140 = vector.multi_reduction <add>, %139, %cst_47 [0] : vector<2x8x32xf32> to vector<8x32xf32>
    %c0_48 = arith.constant 0 : index
    %c0_49 = arith.constant 0 : index
    %141 = vector.load %arg4[%c0_48, %c0_49] : memref<8x32xf32, #tpu.memory_space<vmem>>, vector<8x32xf32>
    tpu.vector_store %arg4[%c0_48, %c0_49], %140 {strides = array<i32>} : memref<8x32xf32, #tpu.memory_space<vmem>>, vector<8x32xf32>,
    return
  }
  func.func @transform_0(%arg0: i32) -> (i32, i32) {
    %c0_i32 = arith.constant 0 : i32
    %c0_i32_0 = arith.constant 0 : i32
    return %arg0, %c0_i32 : i32, i32
  }
  func.func @transform_1(%arg0: i32) -> (i32, i32) {
    %c0_i32 = arith.constant 0 : i32
    %c0_i32_0 = arith.constant 0 : i32
    return %arg0, %c0_i32 : i32, i32
  }
  func.func @transform_2(%arg0: i32) -> (i32, i32) {
    %c0_i32 = arith.constant 0 : i32
    %c0_i32_0 = arith.constant 0 : i32
    return %arg0, %c0_i32 : i32, i32
  }
  func.func @transform_3(%arg0: i32) -> (i32, i32) {
    %c0_i32 = arith.constant 0 : i32
    %c0_i32_0 = arith.constant 0 : i32
    return %arg0, %c0_i32 : i32, i32
  }
}

</mosaic_0001>

<bundles_post_ra>
// kernel: tpu_custom_call.1
= control target key start
LH: loop header
LB: loop body
LE: loop exit
PB: predicated region body
PF: predicated region fallthrough
CT: control target
= control target key end

     0   :  { %9 = vsyncpa [#allocation3], 0  ;;  %s630_s0 = inlined_call_operand.hbm [shape: f32[16,32], index: 0, kind: input, shape index: {}]   ;;  %s631_s1 = inlined_call_operand.hbm [shape: f32[16,32], index: 1, kind: input, shape index: {}]   ;;  %s632_s2 = inlined_call_operand.hbm [shape: f32[8,32], index: 2, kind: output, shape index: {0}]   ;;  %s633_s3 = inlined_call_operand.hbm [shape: f32[8,32], index: 3, kind: output, shape index: {1}]  }
   0x1   :  { %10 = vsyncpa [#allocation6], 0 }
   0x2   :  { %11 = vsyncpa [#allocation4], 0 }
   0x3   :  { %12 = vsyncpa [#allocation9], 0  ;;  %s441_s12 = smov [#allocation2]   ;;  %s345_s16 = scalar_lea.hbm %s630_s0, 256 }
   0x4   :  { %s18_s13 = sshll.u32 %s441_s12, 4  ;;  %p346_p0 = scmp.ne.s32.totalorder %s630_s0, %s345_s16  ;;  %s19_s13 = int_to_ptr.vmem [resolvable:$true] %s18_s13 }
   0x5   :  { %p349_p1 = scmp.lt.u32.totalorder %s345_s16, %s630_s0 }
   0x7   :  { %p351_p2 = pnand %p349_p1, %p346_p0 }
   0x9   :  { %354 = shalt.err (!%p351_p2)
}
   0xa   :  { %s355_s21 = scalar_lea.vmem %s19_s13, 256  ;;  %p360_p4 = scmp.lt.s32.totalorder %s19_s13, %s19_s13 }
   0xb   :  { %p356_p3 = scmp.ne.s32.totalorder %s19_s13, %s355_s21  ;;  %p361_p5 = scmp.lt.s32.totalorder %s355_s21, %s355_s21 }
   0xd   :  { %p362_p6 = por %p361_p5, %p360_p4 }
   0xf   :  { %p363_p7 = pnand %p362_p6, %p356_p3 }
  0x11   :  { %366 = shalt.err (!%p363_p7)
}
  0x12   :  { %s442_s22 = smov 128   ;;  %s443_s23 = smov 8  }
  0x13   :  { %24 = dma.hbm_to_vmem [thread:$0]  %s630_s0, 256, %s19_s13, [#allocation3], %s442_s22, %s442_s22, %s443_s23  }
  0x14   :  { %s444_s26 = smov [#allocation5]   ;;  %s367_s30 = scalar_lea.hbm %s631_s1, 256 }
  0x15   :  { %s30_s27 = sshll.u32 %s444_s26, 4  ;;  %p368_p8 = scmp.ne.s32.totalorder %s631_s1, %s367_s30  ;;  %s31_s27 = int_to_ptr.vmem [resolvable:$true] %s30_s27 }
  0x16   :  { %p371_p9 = scmp.lt.u32.totalorder %s367_s30, %s631_s1 }
  0x18   :  { %p373_p10 = pnand %p371_p9, %p368_p8 }
  0x1a   :  { %376 = shalt.err (!%p373_p10)
}
  0x1b   :  { %s377_s8 = scalar_lea.vmem %s31_s27, 256  ;;  %p382_p12 = scmp.lt.s32.totalorder %s31_s27, %s31_s27 }
  0x1c   :  { %p378_p11 = scmp.ne.s32.totalorder %s31_s27, %s377_s8  ;;  %p383_p13 = scmp.lt.s32.totalorder %s377_s8, %s377_s8 }
  0x1e   :  { %p384_p0 = por %p383_p13, %p382_p12 }
  0x20   :  { %p385_p1 = pnand %p384_p0, %p378_p11 }
  0x22   :  { %388 = shalt.err (!%p385_p1)
}
  0x23   :  { %36 = dma.hbm_to_vmem [thread:$0]  %s631_s1, 256, %s31_s27, [#allocation6], %s442_s22, %s442_s22, %s443_s23  }
  0x24   :  { %433 = dma.done.wait [#allocation3], 256  }
  0x25   :  { %434 = vsyncadd [#allocation3], 4294967040 }
  0x26   :  { %435 = dma.done.wait [#allocation6], 256  }
  0x27   :  { %436 = vsyncadd [#allocation6], 4294967040  ;;  %v494_v0 = vld [vmem:[#allocation2] sm:$0xff]  ;;  %v496_v1 = vld [vmem:[#allocation5] sm:$0xff]  ;;  %s445_s10 = smov 32   ;;  %vm123_vm0 = vcmask 1047808  }
  0x28   :  { %124 = vrot.lane.b32.xlu0 %v494_v0, %s445_s10  ;;  %196 = vrot.lane.b32.xlu1 %v496_v1, %s445_s10  ;;  %v500_v2 = vld [vmem:[#allocation2 + $0x8] sm:$0xff]  ;;  %v502_v3 = vld [vmem:[#allocation5 + $0x8] sm:$0xff]  ;;  %s446_s1 = smov 97   ;;  %s447_s11 = smov 127   ;;  %v106_v20 = vsub.f32 1.0, %v494_v0  ;;  %v104_v31 = vsub.f32 1.0, %v496_v1 }
  0x29   :  { %v107_v21 = vsub.f32 1.0, %v500_v2  ;;  %v96_v22 = vadd.f32 1e-15, %v494_v0  ;;  %v97_v23 = vadd.f32 1e-15, %v500_v2  ;;  %v105_v34 = vsub.f32 1.0, %v502_v3 }
  0x2a   :  { %v108_v24 = vadd.f32 1e-15, %v106_v20  ;;  %v94_v26 = vmul.f32 -1.12, %v496_v1  ;;  %v95_v28 = vmul.f32 -1.12, %v502_v3 }
  0x2b   :  { %321 = vlog2.f32 %v96_v22  ;;  %v109_v25 = vadd.f32 1e-15, %v107_v21  ;;  %vm118_vm1 = vcmask 261120   ;;  %s448_s12 = smov [#allocation7]  }
  0x2c   :  { %127 = vrot.lane.b32.xlu0 %v500_v2, %s445_s10  ;;  %199 = vrot.lane.b32.xlu1 %v502_v3, %s445_s10  ;;  %323 = vlog2.f32 %v97_v23  ;;  %s288_s13 = sshll.u32 %s448_s12, 4  ;;  %s289_s13 = int_to_ptr.vmem [resolvable:$true] %s288_s13 }
  0x2d   :  { %325 = vlog2.f32 %v108_v24  ;;  %s389_s14 = scalar_lea.vmem %s289_s13, 128  ;;  %p394_p3 = scmp.lt.s32.totalorder %s289_s13, %s289_s13 }
  0x2e   :  { %327 = vlog2.f32 %v109_v25  ;;  %p390_p2 = scmp.ne.s32.totalorder %s289_s13, %s389_s14  ;;  %p395_p4 = scmp.lt.s32.totalorder %s389_s14, %s389_s14 }
  0x30   :  { %p396_p5 = por %p395_p4, %p394_p3 }
  0x32   :  { %p397_p6 = pnand %p396_p5, %p390_p2 }
  0x35   :  { %v322_v27 = vpop.eup %321 }
  0x36   :  { %v324_v29 = vpop.eup %323  ;;  %v99_v30 = vmul.f32 0.6931472, %v322_v27 }
  0x37   :  { %v326_v32 = vpop.eup %325  ;;  %v101_v33 = vmul.f32 0.6931472, %v324_v29 }
  0x38   :  { %v328_v35 = vpop.eup %327  ;;  %v102_v36 = vmul.f32 %v99_v30, %v94_v26  ;;  %v111_v37 = vmul.f32 0.6931472, %v326_v32 }
  0x39   :  { %v103_v38 = vmul.f32 %v101_v33, %v95_v28  ;;  %v113_v39 = vmul.f32 0.6931472, %v328_v35 }
  0x3a   :  { %v114_v40 = vmul.f32 %v111_v37, %v104_v31 }
  0x3b   :  { %v115_v41 = vmul.f32 %v113_v39, %v105_v34 }
  0x3c   :  { %v116_v42 = vsub.f32 %v102_v36, %v114_v40 }
  0x3d   :  { %v117_v43 = vsub.f32 %v103_v38, %v115_v41 }
  0x3e   :  { %v119_v44 = vsel %vm118_vm1, %v116_v42, 0.0 }
  0x3f   :  { %v120_v45 = vsel %vm118_vm1, %v117_v43, 0.0 }
  0x40   :  { %v121_v46 = vadd.f32 %v120_v45, %v119_v44 }
  0x42   :  { %122 = vst.msk [vmem:[#allocation7] sm:$0xff] %vm118_vm1, %v121_v46 }
  0x9a   :  { %v125_v4 = vpop.permute.xlu0 %124  ;;  %v197_v5 = vpop.permute.xlu1 %196 }
  0x9b   :  { %v126_v6 = vsel %vm123_vm0, %v125_v4, %v494_v0  ;;  %v198_v7 = vsel %vm123_vm0, %v197_v5, %v496_v1 }
  0x9c   :  { %130 = vrot.lane.b32.xlu0 %v126_v6, %s445_s10 }
  0x9e   :  { %v128_v8 = vpop.permute.xlu0 %127  ;;  %v200_v9 = vpop.permute.xlu1 %199 }
  0x9f   :  { %v129_v10 = vsel %vm123_vm0, %v128_v8, %v500_v2  ;;  %v201_v11 = vsel %vm123_vm0, %v200_v9, %v502_v3 }
  0xa0   :  { %132 = vrot.lane.b32.xlu1 %v129_v10, %s445_s10  ;;  %202 = vrot.lane.b32.xlu0 %v198_v7, %s445_s10 }
  0xa4   :  { %204 = vrot.lane.b32.xlu1 %v201_v11, %s445_s10 }
 0x10e   :  { %v131_v12 = vpop.permute.xlu0 %130 }
 0x10f   :  { %v134_v13 = vsel %vm123_vm0, %v131_v12, %v494_v0 }
 0x110   :  { %140 = vrot.lane.b32.xlu0 %v134_v13, %s446_s1 }
 0x112   :  { %v133_v14 = vpop.permute.xlu1 %132  ;;  %v203_v15 = vpop.permute.xlu0 %202 }
 0x113   :  { %v135_v16 = vsel %vm123_vm0, %v133_v14, %v500_v2  ;;  %v206_v17 = vsel %vm123_vm0, %v203_v15, %v496_v1 }
 0x114   :  { %142 = vrot.lane.b32.xlu1 %v135_v16, %s446_s1  ;;  %150 = vrot.lane.b32.xlu0 %v134_v13, %s447_s11 }
 0x116   :  { %v205_v18 = vpop.permute.xlu1 %204 }
 0x117   :  { %v207_v19 = vsel %vm123_vm0, %v205_v18, %v502_v3 }
 0x118   :  { %152 = vrot.lane.b32.xlu1 %v135_v16, %s447_s11  ;;  %210 = vrot.lane.b32.xlu0 %v206_v17, %s446_s1 }
 0x11c   :  { %212 = vrot.lane.b32.xlu1 %v207_v19, %s446_s1  ;;  %218 = vrot.lane.b32.xlu0 %v206_v17, %s447_s11 }
 0x120   :  { %220 = vrot.lane.b32.xlu1 %v207_v19, %s447_s11 }
 0x121   :  { %400 = shalt.err (!%p397_p6)
}
 0x122   :  { %s401_s17 = scalar_lea.hbm %s632_s2, 128 }
 0x123   :  { %p402_p7 = scmp.ne.s32.totalorder %s632_s2, %s401_s17  ;;  %p405_p8 = scmp.lt.u32.totalorder %s401_s17, %s632_s2 }
 0x125   :  { %p407_p9 = pnand %p405_p8, %p402_p7 }
 0x127   :  { %410 = shalt.err (!%p407_p9)
}
 0x128   :  { %291 = dma.vmem_to_hbm [thread:$0]  %s289_s13, 128, %s632_s2, [#allocation4]   ;;  %v47_v47 = vlaneseq  ;;  %v185_v21 = vmul.f32 9.0, %v500_v2  ;;  %v242_v51 = vmul.f32 9.0, %v496_v1 }
 0x129   :  { %s449_s2 = smov [#allocation8]  }
 0x12a   :  { %v48_v48 = vand.u32 127, %v47_v47  ;;  %v545_v50 = vshrl.u32 %v47_v47, 7  ;;  %v243_v47 = vmul.f32 9.0, %v502_v3  ;;  %s298_s24 = sshll.u32 %s449_s2, 4  ;;  %s299_s24 = int_to_ptr.vmem [resolvable:$true] %s298_s24 }
 0x12b   :  { %s411_s25 = scalar_lea.vmem %s299_s24, 128  ;;  %p416_p11 = scmp.lt.s32.totalorder %s299_s24, %s299_s24 }
 0x12c   :  { %v53_v49 = vand.u32 15, %v48_v48  ;;  %v63_v55 = vadd.s32 8, %v545_v50  ;;  %v68_v62 = vand.u32 15, %v545_v50  ;;  %vm164_vm4 = vcmp.lt.s32.totalorder %v545_v50, 1  ;;  %p412_p10 = scmp.ne.s32.totalorder %s299_s24, %s411_s25  ;;  %p417_p12 = scmp.lt.s32.totalorder %s411_s25, %s411_s25 }
 0x12d   :  { %vm175_vm7 = vcmp.lt.s32.totalorder %v545_v50, 7 }
 0x12e   :  { %vm547_vm2 = vcmp.ne.s32.totalorder %v53_v49, 0  ;;  %vm553_vm3 = vcmp.ne.s32.totalorder %v53_v49, 15  ;;  %v75_v63 = vand.u32 15, %v63_v55  ;;  %vm570_vm5 = vcmp.ne.s32.totalorder %v68_v62, 0  ;;  %p418_p13 = por %p417_p12, %p416_p11 }
 0x130   :  { %vm574_vm6 = vcmp.ne.s32.totalorder %v75_v63, 15  ;;  %p419_p0 = pnand %p418_p13, %p412_p10 }
 0x182   :  { %v141_v52 = vpop.permute.xlu0 %140 }
 0x183   :  { %v146_v53 = vsel %vm547_vm2, %v141_v52, 0.0 }
 0x184   :  { %v158_v58 = vadd.f32 %v146_v53, %v494_v0 }
 0x186   :  { %v143_v56 = vpop.permute.xlu1 %142  ;;  %v151_v57 = vpop.permute.xlu0 %150 }
 0x187   :  { %v147_v59 = vsel %vm547_vm2, %v143_v56, 0.0  ;;  %v156_v60 = vsel %vm553_vm3, %v151_v57, 0.0 }
 0x188   :  { %v160_v61 = vadd.f32 %v158_v58, %v156_v60  ;;  %v159_v4 = vadd.f32 %v147_v59, %v500_v2  ;;  %v184_v2 = vmul.f32 9.0, %v494_v0 }
 0x18a   :  { %v153_v5 = vpop.permute.xlu1 %152  ;;  %v211_v6 = vpop.permute.xlu0 %210  ;;  %v162_v10 = vrot.slane %v160_v61, 7  ;;  %v173_v13 = vrot.slane %v160_v61, 1 }
 0x18b   :  { %v157_v7 = vsel %vm553_vm3, %v153_v5, 0.0  ;;  %v216_v8 = vsel %vm547_vm2, %v211_v6, 0.0 }
 0x18c   :  { %v161_v9 = vadd.f32 %v159_v4, %v157_v7  ;;  %v226_v16 = vadd.f32 %v216_v8, %v496_v1 }
 0x18e   :  { %v163_v14 = vrot.slane %v161_v9, 7  ;;  %v174_v15 = vrot.slane %v161_v9, 1  ;;  %v213_v17 = vpop.permute.xlu1 %212  ;;  %v219_v18 = vpop.permute.xlu0 %218 }
 0x18f   :  { %v217_v19 = vsel %vm547_vm2, %v213_v17, 0.0  ;;  %v224_v20 = vsel %vm553_vm3, %v219_v18, 0.0 }
 0x190   :  { %v165_v22 = vsel %vm164_vm4, %v162_v10, %v163_v14  ;;  %v166_v23 = vsel %vm164_vm4, %v163_v14, %v162_v10  ;;  %v177_v24 = vsel %vm175_vm7, %v174_v15, %v173_v13  ;;  %v227_v28 = vadd.f32 %v217_v19, %v502_v3 }
 0x191   :  { %v171_v25 = vsel %vm570_vm5, %v166_v23, 0.0  ;;  %v183_v26 = vsel %vm574_vm6, %v177_v24, 0.0  ;;  %v187_v27 = vadd.f32 %v165_v22, %v161_v9  ;;  %v228_v30 = vadd.f32 %v226_v16, %v224_v20 }
 0x192   :  { %v186_v29 = vadd.f32 %v171_v25, %v160_v61  ;;  %v221_v31 = vpop.permute.xlu1 %220  ;;  %v176_v32 = vsel %vm175_vm7, %v173_v13, %v174_v15 }
 0x193   :  { %v189_v33 = vadd.f32 %v187_v27, %v183_v26  ;;  %v225_v34 = vsel %vm553_vm3, %v221_v31, 0.0  ;;  %v230_v36 = vrot.slane %v228_v30, 7  ;;  %v236_v39 = vrot.slane %v228_v30, 1 }
 0x194   :  { %v188_v35 = vadd.f32 %v186_v29, %v176_v32  ;;  %v229_v37 = vadd.f32 %v227_v28, %v225_v34 }
 0x195   :  { %v191_v38 = vsub.f32 %v185_v21, %v189_v33 }
 0x196   :  { %v190_v40 = vsub.f32 %v184_v2, %v188_v35  ;;  %v231_v41 = vrot.slane %v229_v37, 7  ;;  %v237_v42 = vrot.slane %v229_v37, 1 }
 0x197   :  { %329 = vtanh.f32 %v191_v38 }
 0x198   :  { %331 = vtanh.f32 %v190_v40  ;;  %v232_v0 = vsel %vm164_vm4, %v230_v36, %v231_v41  ;;  %v233_v43 = vsel %vm164_vm4, %v231_v41, %v230_v36  ;;  %v239_v45 = vsel %vm175_vm7, %v237_v42, %v236_v39 }
 0x199   :  { %v234_v44 = vsel %vm570_vm5, %v233_v43, 0.0  ;;  %v245_v46 = vadd.f32 %v232_v0, %v229_v37  ;;  %v241_v48 = vsel %vm574_vm6, %v239_v45, 0.0  ;;  %v238_v52 = vsel %vm175_vm7, %v236_v39, %v237_v42 }
 0x19a   :  { %v244_v49 = vadd.f32 %v234_v44, %v228_v30 }
 0x19b   :  { %v247_v53 = vadd.f32 %v245_v46, %v241_v48 }
 0x19c   :  { %v246_v54 = vadd.f32 %v244_v49, %v238_v52 }
 0x19d   :  { %v249_v55 = vsub.f32 %v243_v47, %v247_v53 }
 0x19e   :  { %v248_v56 = vsub.f32 %v242_v51, %v246_v54 }
 0x19f   :  { %333 = vtanh.f32 %v249_v55 }
 0x1a0   :  { %335 = vtanh.f32 %v248_v56 }
 0x1a1   :  { %v330_v57 = vpop.eup %329 }
 0x1a2   :  { %v332_v58 = vpop.eup %331  ;;  %v195_v59 = vmax.f32 %v330_v57, 0.0 }
 0x1a3   :  { %v194_v60 = vmax.f32 %v332_v58, 0.0 }
 0x1a4   :  { %337 = vlog2.f32 %v195_v59  ;;  %v261_v3 = vsub.f32 1.0, %v195_v59 }
 0x1a5   :  { %339 = vlog2.f32 %v194_v60  ;;  %v260_v61 = vsub.f32 1.0, %v194_v60 }
 0x1a6   :  { %341 = vlog2.f32 %v261_v3 }
 0x1a7   :  { %343 = vlog2.f32 %v260_v61 }
 0x1a9   :  { %v334_v1 = vpop.eup %333 }
 0x1aa   :  { %v336_v62 = vpop.eup %335  ;;  %v253_v4 = vmax.f32 %v334_v1, 0.0 }
 0x1ab   :  { %v252_v7 = vmax.f32 %v336_v62, 0.0 }
 0x1ac   :  { %v271_v15 = vsub.f32 1.0, %v253_v4 }
 0x1ad   :  { %v270_v17 = vsub.f32 1.0, %v252_v7 }
 0x1ae   :  { %v338_v50 = vpop.eup %337 }
 0x1af   :  { %v340_v63 = vpop.eup %339  ;;  %v257_v5 = vmul.f32 0.6931472, %v338_v50 }
 0x1b0   :  { %v342_v6 = vpop.eup %341  ;;  %v255_v8 = vmul.f32 0.6931472, %v340_v63 }
 0x1b1   :  { %v344_v9 = vpop.eup %343  ;;  %v259_v10 = vmax.f32 %v257_v5, -100.0  ;;  %v265_v11 = vmul.f32 0.6931472, %v342_v6 }
 0x1b2   :  { %v258_v12 = vmax.f32 %v255_v8, -100.0  ;;  %v263_v13 = vmul.f32 0.6931472, %v344_v9 }
 0x1b3   :  { %v267_v14 = vmax.f32 %v265_v11, -100.0  ;;  %v269_v18 = vmul.f32 %v259_v10, %v253_v4 }
 0x1b4   :  { %v266_v16 = vmax.f32 %v263_v13, -100.0  ;;  %v268_v20 = vmul.f32 %v258_v12, %v252_v7 }
 0x1b5   :  { %v273_v19 = vmul.f32 %v271_v15, %v267_v14 }
 0x1b6   :  { %v272_v21 = vmul.f32 %v270_v17, %v266_v16 }
 0x1b7   :  { %v275_v22 = vadd.f32 %v273_v19, %v269_v18 }
 0x1b8   :  { %v274_v23 = vadd.f32 %v272_v21, %v268_v20 }
 0x1b9   :  { %v277_v24 = vsub.f32 0.0, %v275_v22 }
 0x1ba   :  { %v276_v25 = vsub.f32 0.0, %v274_v23 }
 0x1bb   :  { %v279_v26 = vsel %vm118_vm1, %v277_v24, 0.0 }
 0x1bc   :  { %v278_v27 = vsel %vm118_vm1, %v276_v25, 0.0 }
 0x1bd   :  { %v280_v28 = vadd.f32 %v279_v26, %v278_v27 }
 0x1bf   :  { %281 = vst.msk [vmem:[#allocation8] sm:$0xff] %vm118_vm1, %v280_v28 }
 0x1c0   :  { %422 = shalt.err (!%p419_p0)
}
 0x1c1   :  { %s423_s28 = scalar_lea.hbm %s633_s3, 128 }
 0x1c2   :  { %p424_p1 = scmp.ne.s32.totalorder %s633_s3, %s423_s28  ;;  %p427_p2 = scmp.lt.u32.totalorder %s423_s28, %s633_s3 }
 0x1c4   :  { %p429_p3 = pnand %p427_p2, %p424_p1 }
 0x1c6   :  { %432 = shalt.err (!%p429_p3)
}
 0x1c7   :  { %301 = dma.vmem_to_hbm [thread:$0]  %s299_s24, 128, %s633_s3, [#allocation9]  }
 0x1c8   :  { %437 = dma.done.wait [#allocation4], 128  }
 0x1c9   :  { %438 = vsyncadd [#allocation4], 4294967168 }
 0x1ca   :  { %439 = dma.done.wait [#allocation9], 128  }
 0x1cb   :  { %440 = vsyncadd [#allocation9], 4294967168 }
 0x1cc   :  { %308 = vsyncpa [#allocation3], 1 }
 0x1cd   :  { %309 = vsyncpa [#allocation6], 1 }
 0x1ce   :  { %310 = vsyncpa [#allocation4], 1 }
 0x1cf   :  { %311 = vsyncpa [#allocation9], 1 }

</bundles_post_ra>
